<compile_context>
chip_gen: v7x
topology: tpu7x:2x2x1
jax: 0.10.0
libtpu: 0.0.40
codegen_flags: <defaults>
</compile_context>

<pallas_src>
import jax
import jax.numpy as jnp
from jax.experimental import pallas as pl
from jax.experimental.pallas import tpu as pltpu

# ---- static model config (small, consistent with the module defaults) -------
BATCH = 2
N_FEATURES = 4          # input_shape[0]
N_TIMESTEPS = 16        # input_shape[1]
FILTERS = (8, 8)
KERNELS = (3, 3)
POOL = 2
DENSE = (32,)
N_CLASSES = 6

assert len(FILTERS) == len(KERNELS), "filters/kernels length mismatch"
assert N_TIMESTEPS % POOL == 0, "stacked-batch pooling needs stride % pool == 0"

_L = N_TIMESTEPS
for _k in KERNELS:
    _L = _L - (_k - 1)          # valid conv, stride 1
L_CONV = _L                     # length after conv stack
L_POOL = L_CONV // POOL         # length after maxpool
FLATTEN = L_POOL * FILTERS[-1]  # PyTorch flatten_size

PAD_TAIL = sum(k - 1 for k in KERNELS)     # zero rows so tap slices stay in bounds
LP_PAD = N_TIMESTEPS // POOL               # per-sample pooled stride (8)
FLAT_PAD = LP_PAD * FILTERS[-1]            # lane-dense flatten width (64)


def _round_up(x, m):
    return -(-x // m) * m


def _build_pack_layout():
    """Static (Python int) row offsets of every parameter in the packed buffer."""
    lay = {"convs": [], "conv_b": [], "dense": [], "dense_b": []}
    row = 0
    c_in = N_FEATURES
    for f, k in zip(FILTERS, KERNELS):
        tap_rows = _round_up(c_in, 8)                  # 8-aligned per-tap row block
        lay["convs"].append((row, tap_rows, c_in, f, k))
        row += k * tap_rows
        c_in = f
    d_in = FLAT_PAD
    for d in DENSE:
        lay["dense"].append((row, d_in, d))
        row += _round_up(d_in, 8)
        d_in = d
    lay["clf"] = (row, d_in, N_CLASSES)
    row += _round_up(d_in, 8)
    for _ in FILTERS:
        lay["conv_b"].append(row); row += 1
    for _ in DENSE:
        lay["dense_b"].append(row); row += 1
    lay["clf_b"] = row; row += 1
    lay["rows"] = row
    return lay


PACK = _build_pack_layout()
PACK_ROWS = PACK["rows"]
PACK_W = max(max(FILTERS), max(DENSE), N_CLASSES)


# ----------------------------- fused Pallas kernel ---------------------------
def cnn_fused_kernel(x_ref, p_ref, o_ref, xs_ref, flat_ref):
    f32 = jnp.float32
    B, L, c_in0 = x_ref.shape                           # (B, n_timesteps, n_features)

    # (1) Stack the batch along the sublane axis once; zero tail rows keep the
    #     conv tap slices in bounds (they only ever feed garbage rows).
    for b in range(B):
        xs_ref[b * L:(b + 1) * L, :] = x_ref[b]
    xs_ref[B * L:B * L + PAD_TAIL, :] = jnp.zeros((PAD_TAIL, c_in0), f32)

    # (2) Conv stack: each tap is ONE batched matmul over all stacked rows;
    #     back-to-back dots into a single f32 accumulator seeded by tap 0
    #     (no zeros+add); first-conv taps are offset loads from the Ref.
    rows = B * L + PAD_TAIL
    h = None
    for li, ((off, tap_rows, c_in, c_out, k), b_row) in enumerate(
            zip(PACK["convs"], PACK["conv_b"])):
        rows = rows - (k - 1)
        acc = None
        for t in range(k):
            w_t = p_ref[off + t * tap_rows: off + t * tap_rows + c_in, 0:c_out]
            lhs = xs_ref[t:t + rows, :] if li == 0 else h[t:t + rows, :]
            d = jnp.dot(lhs, w_t, preferred_element_type=f32)
            acc = d if acc is None else acc + d
        h = jnp.maximum(acc + p_ref[b_row:b_row + 1, 0:c_out], 0.0)

    # TODO(synk): nn.Dropout implemented as inference-mode identity (no RNG mask).

    # (3) MaxPool1d over sublane pairs, batched over the stacked rows.  Valid
    #     rows per sample occupy whole pool windows, so the cross-sample garbage
    #     rows stay in their own (unused) windows and never mix in.
    c_last = FILTERS[-1]
    pooled = jnp.max(h.reshape(B * L // POOL, POOL, c_last), axis=1)   # (B*LP_PAD, C)
    pooled3 = pooled.reshape(B, LP_PAD, c_last)                        # (B, LP_PAD, C)

    # (4) Flatten to a lane-dense (B, FLAT_PAD) scratch in (position, channel)
    #     order — matches the permuted first dense weight; pooled slots with
    #     l >= L_POOL hit zero-padded weight rows and contribute nothing.
    for l in range(LP_PAD):
        flat_ref[:, l * c_last:(l + 1) * c_last] = pooled3[:, l, :]
    hd = flat_ref[...]                                                 # (B, FLAT_PAD)

    # (5) Dense stack (+ReLU) and classifier, all batched (B, F) @ (F, D).
    for (off, d_in, d_out), b_row in zip(PACK["dense"], PACK["dense_b"]):
        hd = jnp.maximum(
            jnp.dot(hd, p_ref[off:off + d_in, 0:d_out], preferred_element_type=f32)
            + p_ref[b_row:b_row + 1, 0:d_out], 0.0)
    off, d_in, d_out = PACK["clf"]
    b_row = PACK["clf_b"]
    logits = (jnp.dot(hd, p_ref[off:off + d_in, 0:d_out], preferred_element_type=f32)
              + p_ref[b_row:b_row + 1, 0:d_out])
    o_ref[...] = logits.astype(o_ref.dtype)            # one (B, n_classes) store


# ----------------------------- wrapper ---------------------------------------
def cnn_forward(x_ncw, packed):
    """x_ncw: (B, n_features, n_timesteps) like PyTorch NCW; packed: (rows, W) f32."""
    B = x_ncw.shape[0]
    # NCW -> NLC boundary transpose; allow_input_fusion lets XLA fold it into
    # the pallas_call input instead of a separate dispatch + HBM round trip.
    x = jnp.transpose(x_ncw, (0, 2, 1))

    flops = 0
    l, c_in = N_TIMESTEPS, N_FEATURES
    for f, k in zip(FILTERS, KERNELS):
        l -= (k - 1)
        flops += 2 * B * l * k * c_in * f
        c_in = f
    f_in = FLATTEN
    for d in DENSE:
        flops += 2 * B * f_in * d
        f_in = d
    flops += 2 * B * f_in * N_CLASSES
    bytes_accessed = (x.size + packed.size + B * N_CLASSES) * 4

    return pl.pallas_call(
        cnn_fused_kernel,
        out_shape=jax.ShapeDtypeStruct((B, N_CLASSES), jnp.float32),
        scratch_shapes=[
            pltpu.VMEM((B * N_TIMESTEPS + PAD_TAIL, N_FEATURES), jnp.float32),  # stacked x
            pltpu.VMEM((B, FLAT_PAD), jnp.float32),                             # flatten
        ],
        compiler_params=pltpu.CompilerParams(allow_input_fusion=[True, False]),
        cost_estimate=pl.CostEstimate(flops=int(flops), transcendentals=0,
                                      bytes_accessed=int(bytes_accessed)),
    )(x, packed)


# ----------------------------- params ----------------------------------------
def init_params(key):
    """PyTorch-layout parameters, deterministic uniform init."""
    params = {"convs": [], "dense": [], "clf": None}
    c_in = N_FEATURES
    for f, k in zip(FILTERS, KERNELS):
        key, kw, kb = jax.random.split(key, 3)
        bound = 1.0 / float((c_in * k) ** 0.5)
        w = jax.random.uniform(kw, (f, c_in, k), jnp.float32, -bound, bound)
        b = jax.random.uniform(kb, (f,), jnp.float32, -bound, bound)
        params["convs"].append((w, b))
        c_in = f
    in_dim = FLATTEN
    for d in DENSE:
        key, kw, kb = jax.random.split(key, 3)
        bound = 1.0 / float(in_dim ** 0.5)
        w = jax.random.uniform(kw, (d, in_dim), jnp.float32, -bound, bound)
        b = jax.random.uniform(kb, (d,), jnp.float32, -bound, bound)
        params["dense"].append((w, b))
        in_dim = d
    key, kw, kb = jax.random.split(key, 3)
    bound = 1.0 / float(in_dim ** 0.5)
    w = jax.random.uniform(kw, (N_CLASSES, in_dim), jnp.float32, -bound, bound)
    b = jax.random.uniform(kb, (N_CLASSES,), jnp.float32, -bound, bound)
    params["clf"] = (w, b)
    return params


def prepare_params(params):
    """One-time layout prep: pack every weight/bias into ONE (rows, W) f32 buffer.

    Conv weights are stored per tap as (C_in, C_out) row blocks; the first dense
    weight's rows are permuted from PyTorch's channel-major flatten order
    (f = c*L_pool + l) to the kernel's position-major order (f' = l*C + c) and
    zero-padded to FLAT_PAD rows; all other dense / classifier weights are
    stored as (F_in, F_out); biases are single rows."""
    buf = jnp.zeros((PACK_ROWS, PACK_W), jnp.float32)
    c_last = FILTERS[-1]

    for (off, tap_rows, c_in, c_out, k), (w, _b) in zip(PACK["convs"], params["convs"]):
        for t in range(k):
            buf = buf.at[off + t * tap_rows: off + t * tap_rows + c_in,
                         0:c_out].set(w[:, :, t].T)                    # (C_in, C_out)
    for row, (w, b) in zip(PACK["conv_b"], params["convs"]):
        buf = buf.at[row, 0:w.shape[0]].set(b)

    for i, ((off, d_in, d_out), (w, _b)) in enumerate(zip(PACK["dense"], params["dense"])):
        wt = jnp.transpose(w, (1, 0))                                  # (F_in, F_out)
        if i == 0:
            wt = wt.reshape(c_last, L_POOL, d_out).transpose(1, 0, 2)  # -> (l, c, d)
            wt = wt.reshape(L_POOL * c_last, d_out)
            pad = jnp.zeros((FLAT_PAD - L_POOL * c_last, d_out), jnp.float32)
            wt = jnp.concatenate([wt, pad], axis=0)                    # (FLAT_PAD, d)
        buf = buf.at[off:off + wt.shape[0], 0:d_out].set(wt)
    for row, (w, b) in zip(PACK["dense_b"], params["dense"]):
        buf = buf.at[row, 0:w.shape[0]].set(b)

    off, d_in, d_out = PACK["clf"]
    w, b = params["clf"]
    buf = buf.at[off:off + d_in, 0:d_out].set(jnp.transpose(w, (1, 0)))
    buf = buf.at[PACK["clf_b"], 0:d_out].set(b)
    return buf


# ----------------------------- pure-JAX reference ----------------------------
def cnn_reference(x_ncw, params):
    """Pure-JAX reference mirroring the PyTorch forward (eval mode)."""
    h = x_ncw
    for (w, b) in params["convs"]:
        h = jax.lax.conv_general_dilated(
            h, w, window_strides=(1,), padding="VALID",
            dimension_numbers=("NCH", "OIH", "NCH"))
        h = jnp.maximum(h + b[None, :, None], 0.0)
    B, C, L = h.shape
    lp = L // POOL
    h = h[:, :, :lp * POOL].reshape(B, C, lp, POOL).max(axis=-1)
    h = h.reshape(B, -1)
    for (w, b) in params["dense"]:
        h = jnp.maximum(h @ w.T + b, 0.0)
    w, b = params["clf"]
    return h @ w.T + b


if __name__ == "__main__":
    key = jax.random.PRNGKey(0)
    key, kx = jax.random.split(key)
    x = jax.random.normal(kx, (BATCH, N_FEATURES, N_TIMESTEPS), jnp.float32)
    params = init_params(key)
    packed = prepare_params(params)            # one-time weight packing / layout prep

    fwd = jax.jit(cnn_forward)
    out = jax.block_until_ready(fwd(x, packed))
    ref = jax.block_until_ready(cnn_reference(x, params))

    assert out.shape == (BATCH, N_CLASSES), out.shape
    assert jnp.max(jnp.abs(out - ref)) < 1e-4, "mismatch vs pure-JAX reference"
    print("KERNEL_OK")
</pallas_src>

<mosaic_0001>
module attributes {stable_mosaic.version = 11 : i64} {
  func.func @cnn_fused_kernel(%arg0: memref<2x16x4xf32, #tpu.memory_space<vmem>>, %arg1: memref<148x32xf32, #tpu.memory_space<vmem>>, %arg2: memref<2x6xf32, #tpu.memory_space<vmem>>, %arg3: memref<36x4xf32, #tpu.memory_space<vmem>>, %arg4: memref<2x64xf32, #tpu.memory_space<vmem>>) attributes {dimension_semantics = [], scalar_prefetch = 0 : i64, scratch_operands = 2 : i64, tpu.core_type = #tpu.core_type<tc>} {
    %c0 = arith.constant 0 : index
    %c0_0 = arith.constant 0 : index
    %c0_1 = arith.constant 0 : index
    %0 = vector.load %arg0[%c0, %c0_0, %c0_1] : memref<2x16x4xf32, #tpu.memory_space<vmem>>, vector<1x16x4xf32>
    %1 = vector.shape_cast %0 : vector<1x16x4xf32> to vector<16x4xf32>
    %c0_2 = arith.constant 0 : index
    %c0_3 = arith.constant 0 : index
    %2 = vector.load %arg3[%c0_2, %c0_3] : memref<36x4xf32, #tpu.memory_space<vmem>>, vector<16x4xf32>
    tpu.vector_store %arg3[%c0_2, %c0_3], %1 {strides = array<i32>} : memref<36x4xf32, #tpu.memory_space<vmem>>, vector<16x4xf32>,
    %c1 = arith.constant 1 : index
    %c0_4 = arith.constant 0 : index
    %c0_5 = arith.constant 0 : index
    %3 = vector.load %arg0[%c1, %c0_4, %c0_5] : memref<2x16x4xf32, #tpu.memory_space<vmem>>, vector<1x16x4xf32>
    %4 = vector.shape_cast %3 : vector<1x16x4xf32> to vector<16x4xf32>
    %c16 = arith.constant 16 : index
    %c0_6 = arith.constant 0 : index
    %5 = vector.load %arg3[%c16, %c0_6] : memref<36x4xf32, #tpu.memory_space<vmem>>, vector<16x4xf32>
    tpu.vector_store %arg3[%c16, %c0_6], %4 {strides = array<i32>} : memref<36x4xf32, #tpu.memory_space<vmem>>, vector<16x4xf32>,
    %cst = arith.constant 0.000000e+00 : f32
    %6 = vector.broadcast %cst : f32 to vector<4x4xf32>
    %c32 = arith.constant 32 : index
    %c0_7 = arith.constant 0 : index
    %7 = vector.load %arg3[%c32, %c0_7] : memref<36x4xf32, #tpu.memory_space<vmem>>, vector<4x4xf32>
    tpu.vector_store %arg3[%c32, %c0_7], %6 {strides = array<i32>} : memref<36x4xf32, #tpu.memory_space<vmem>>, vector<4x4xf32>,
    %c0_8 = arith.constant 0 : index
    %c0_9 = arith.constant 0 : index
    %8 = vector.load %arg1[%c0_8, %c0_9] : memref<148x32xf32, #tpu.memory_space<vmem>>, vector<4x8xf32>
    %c0_10 = arith.constant 0 : index
    %c0_11 = arith.constant 0 : index
    %9 = vector.load %arg3[%c0_10, %c0_11] : memref<36x4xf32, #tpu.memory_space<vmem>>, vector<34x4xf32>
    %cst_12 = arith.constant dense<0.000000e+00> : vector<34x8xf32>
    %10 = tpu.matmul %9, %8, %cst_12 {dimension_numbers = #tpu.dot_dimension_numbers<[1], [0], [0], [1], [0, 0, 1, 1], [], []>} : vector<34x4xf32>, vector<4x8xf32>, vector<34x8xf32> -> vector<34x8xf32>
    %c8 = arith.constant 8 : index
    %c0_13 = arith.constant 0 : index
    %11 = vector.load %arg1[%c8, %c0_13] : memref<148x32xf32, #tpu.memory_space<vmem>>, vector<4x8xf32>
    %c1_14 = arith.constant 1 : index
    %c0_15 = arith.constant 0 : index
    %12 = vector.load %arg3[%c1_14, %c0_15] : memref<36x4xf32, #tpu.memory_space<vmem>>, vector<34x4xf32>
    %cst_16 = arith.constant dense<0.000000e+00> : vector<34x8xf32>
    %13 = tpu.matmul %12, %11, %cst_16 {dimension_numbers = #tpu.dot_dimension_numbers<[1], [0], [0], [1], [0, 0, 1, 1], [], []>} : vector<34x4xf32>, vector<4x8xf32>, vector<34x8xf32> -> vector<34x8xf32>
    %14 = arith.addf %10, %13 : vector<34x8xf32>
    %c16_17 = arith.constant 16 : index
    %c0_18 = arith.constant 0 : index
    %15 = vector.load %arg1[%c16_17, %c0_18] : memref<148x32xf32, #tpu.memory_space<vmem>>, vector<4x8xf32>
    %c2 = arith.constant 2 : index
    %c0_19 = arith.constant 0 : index
    %16 = vector.load %arg3[%c2, %c0_19] : memref<36x4xf32, #tpu.memory_space<vmem>>, vector<34x4xf32>
    %cst_20 = arith.constant dense<0.000000e+00> : vector<34x8xf32>
    %17 = tpu.matmul %16, %15, %cst_20 {dimension_numbers = #tpu.dot_dimension_numbers<[1], [0], [0], [1], [0, 0, 1, 1], [], []>} : vector<34x4xf32>, vector<4x8xf32>, vector<34x8xf32> -> vector<34x8xf32>
    %18 = arith.addf %14, %17 : vector<34x8xf32>
    %c144 = arith.constant 144 : index
    %c0_21 = arith.constant 0 : index
    %19 = vector.load %arg1[%c144, %c0_21] : memref<148x32xf32, #tpu.memory_space<vmem>>, vector<1x8xf32>
    %20 = vector.broadcast %19 : vector<1x8xf32> to vector<34x8xf32>
    %21 = arith.addf %18, %20 : vector<34x8xf32>
    %cst_22 = arith.constant 0.000000e+00 : f32
    %22 = vector.broadcast %cst_22 : f32 to vector<34x8xf32>
    %23 = arith.maximumf %21, %22 : vector<34x8xf32>
    %c24 = arith.constant 24 : index
    %c0_23 = arith.constant 0 : index
    %24 = vector.load %arg1[%c24, %c0_23] : memref<148x32xf32, #tpu.memory_space<vmem>>, vector<8x8xf32>
    %25 = vector.extract_strided_slice %23 {offsets = [0, 0], sizes = [32, 8], strides = [1, 1]} : vector<34x8xf32> to vector<32x8xf32>
    %cst_24 = arith.constant dense<0.000000e+00> : vector<32x8xf32>
    %26 = tpu.matmul %25, %24, %cst_24 {dimension_numbers = #tpu.dot_dimension_numbers<[1], [0], [0], [1], [0, 0, 1, 1], [], []>} : vector<32x8xf32>, vector<8x8xf32>, vector<32x8xf32> -> vector<32x8xf32>
    %c32_25 = arith.constant 32 : index
    %c0_26 = arith.constant 0 : index
    %27 = vector.load %arg1[%c32_25, %c0_26] : memref<148x32xf32, #tpu.memory_space<vmem>>, vector<8x8xf32>
    %28 = vector.extract_strided_slice %23 {offsets = [1, 0], sizes = [32, 8], strides = [1, 1]} : vector<34x8xf32> to vector<32x8xf32>
    %cst_27 = arith.constant dense<0.000000e+00> : vector<32x8xf32>
    %29 = tpu.matmul %28, %27, %cst_27 {dimension_numbers = #tpu.dot_dimension_numbers<[1], [0], [0], [1], [0, 0, 1, 1], [], []>} : vector<32x8xf32>, vector<8x8xf32>, vector<32x8xf32> -> vector<32x8xf32>
    %30 = arith.addf %26, %29 : vector<32x8xf32>
    %c40 = arith.constant 40 : index
    %c0_28 = arith.constant 0 : index
    %31 = vector.load %arg1[%c40, %c0_28] : memref<148x32xf32, #tpu.memory_space<vmem>>, vector<8x8xf32>
    %32 = vector.extract_strided_slice %23 {offsets = [2, 0], sizes = [32, 8], strides = [1, 1]} : vector<34x8xf32> to vector<32x8xf32>
    %cst_29 = arith.constant dense<0.000000e+00> : vector<32x8xf32>
    %33 = tpu.matmul %32, %31, %cst_29 {dimension_numbers = #tpu.dot_dimension_numbers<[1], [0], [0], [1], [0, 0, 1, 1], [], []>} : vector<32x8xf32>, vector<8x8xf32>, vector<32x8xf32> -> vector<32x8xf32>
    %34 = arith.addf %30, %33 : vector<32x8xf32>
    %c145 = arith.constant 145 : index
    %c0_30 = arith.constant 0 : index
    %35 = vector.load %arg1[%c145, %c0_30] : memref<148x32xf32, #tpu.memory_space<vmem>>, vector<1x8xf32>
    %36 = vector.broadcast %35 : vector<1x8xf32> to vector<32x8xf32>
    %37 = arith.addf %34, %36 : vector<32x8xf32>
    %cst_31 = arith.constant 0.000000e+00 : f32
    %38 = vector.broadcast %cst_31 : f32 to vector<32x8xf32>
    %39 = arith.maximumf %37, %38 : vector<32x8xf32>
    %40 = vector.shape_cast %39 : vector<32x8xf32> to vector<16x2x8xf32>
    %cst_32 = arith.constant dense<0xFF800000> : vector<16x8xf32>
    %41 = vector.multi_reduction <maximumf>, %40, %cst_32 [1] : vector<16x2x8xf32> to vector<16x8xf32>
    %42 = vector.shape_cast %41 : vector<16x8xf32> to vector<2x8x8xf32>
    %43 = vector.extract_strided_slice %42 {offsets = [0, 0, 0], sizes = [2, 1, 8], strides = [1, 1, 1]} : vector<2x8x8xf32> to vector<2x1x8xf32>
    %44 = vector.shape_cast %43 : vector<2x1x8xf32> to vector<2x8xf32>
    %c0_33 = arith.constant 0 : index
    %c0_34 = arith.constant 0 : index
    %45 = vector.load %arg4[%c0_33, %c0_34] : memref<2x64xf32, #tpu.memory_space<vmem>>, vector<2x8xf32>
    tpu.vector_store %arg4[%c0_33, %c0_34], %44 {strides = array<i32>} : memref<2x64xf32, #tpu.memory_space<vmem>>, vector<2x8xf32>,
    %46 = vector.extract_strided_slice %42 {offsets = [0, 1, 0], sizes = [2, 1, 8], strides = [1, 1, 1]} : vector<2x8x8xf32> to vector<2x1x8xf32>
    %47 = vector.shape_cast %46 : vector<2x1x8xf32> to vector<2x8xf32>
    %c0_35 = arith.constant 0 : index
    %c8_36 = arith.constant 8 : index
    %48 = vector.load %arg4[%c0_35, %c8_36] : memref<2x64xf32, #tpu.memory_space<vmem>>, vector<2x8xf32>
    tpu.vector_store %arg4[%c0_35, %c8_36], %47 {strides = array<i32>} : memref<2x64xf32, #tpu.memory_space<vmem>>, vector<2x8xf32>,
    %49 = vector.extract_strided_slice %42 {offsets = [0, 2, 0], sizes = [2, 1, 8], strides = [1, 1, 1]} : vector<2x8x8xf32> to vector<2x1x8xf32>
    %50 = vector.shape_cast %49 : vector<2x1x8xf32> to vector<2x8xf32>
    %c0_37 = arith.constant 0 : index
    %c16_38 = arith.constant 16 : index
    %51 = vector.load %arg4[%c0_37, %c16_38] : memref<2x64xf32, #tpu.memory_space<vmem>>, vector<2x8xf32>
    tpu.vector_store %arg4[%c0_37, %c16_38], %50 {strides = array<i32>} : memref<2x64xf32, #tpu.memory_space<vmem>>, vector<2x8xf32>,
    %52 = vector.extract_strided_slice %42 {offsets = [0, 3, 0], sizes = [2, 1, 8], strides = [1, 1, 1]} : vector<2x8x8xf32> to vector<2x1x8xf32>
    %53 = vector.shape_cast %52 : vector<2x1x8xf32> to vector<2x8xf32>
    %c0_39 = arith.constant 0 : index
    %c24_40 = arith.constant 24 : index
    %54 = vector.load %arg4[%c0_39, %c24_40] : memref<2x64xf32, #tpu.memory_space<vmem>>, vector<2x8xf32>
    tpu.vector_store %arg4[%c0_39, %c24_40], %53 {strides = array<i32>} : memref<2x64xf32, #tpu.memory_space<vmem>>, vector<2x8xf32>,
    %55 = vector.extract_strided_slice %42 {offsets = [0, 4, 0], sizes = [2, 1, 8], strides = [1, 1, 1]} : vector<2x8x8xf32> to vector<2x1x8xf32>
    %56 = vector.shape_cast %55 : vector<2x1x8xf32> to vector<2x8xf32>
    %c0_41 = arith.constant 0 : index
    %c32_42 = arith.constant 32 : index
    %57 = vector.load %arg4[%c0_41, %c32_42] : memref<2x64xf32, #tpu.memory_space<vmem>>, vector<2x8xf32>
    tpu.vector_store %arg4[%c0_41, %c32_42], %56 {strides = array<i32>} : memref<2x64xf32, #tpu.memory_space<vmem>>, vector<2x8xf32>,
    %58 = vector.extract_strided_slice %42 {offsets = [0, 5, 0], sizes = [2, 1, 8], strides = [1, 1, 1]} : vector<2x8x8xf32> to vector<2x1x8xf32>
    %59 = vector.shape_cast %58 : vector<2x1x8xf32> to vector<2x8xf32>
    %c0_43 = arith.constant 0 : index
    %c40_44 = arith.constant 40 : index
    %60 = vector.load %arg4[%c0_43, %c40_44] : memref<2x64xf32, #tpu.memory_space<vmem>>, vector<2x8xf32>
    tpu.vector_store %arg4[%c0_43, %c40_44], %59 {strides = array<i32>} : memref<2x64xf32, #tpu.memory_space<vmem>>, vector<2x8xf32>,
    %61 = vector.extract_strided_slice %42 {offsets = [0, 6, 0], sizes = [2, 1, 8], strides = [1, 1, 1]} : vector<2x8x8xf32> to vector<2x1x8xf32>
    %62 = vector.shape_cast %61 : vector<2x1x8xf32> to vector<2x8xf32>
    %c0_45 = arith.constant 0 : index
    %c48 = arith.constant 48 : index
    %63 = vector.load %arg4[%c0_45, %c48] : memref<2x64xf32, #tpu.memory_space<vmem>>, vector<2x8xf32>
    tpu.vector_store %arg4[%c0_45, %c48], %62 {strides = array<i32>} : memref<2x64xf32, #tpu.memory_space<vmem>>, vector<2x8xf32>,
    %64 = vector.extract_strided_slice %42 {offsets = [0, 7, 0], sizes = [2, 1, 8], strides = [1, 1, 1]} : vector<2x8x8xf32> to vector<2x1x8xf32>
    %65 = vector.shape_cast %64 : vector<2x1x8xf32> to vector<2x8xf32>
    %c0_46 = arith.constant 0 : index
    %c56 = arith.constant 56 : index
    %66 = vector.load %arg4[%c0_46, %c56] : memref<2x64xf32, #tpu.memory_space<vmem>>, vector<2x8xf32>
    tpu.vector_store %arg4[%c0_46, %c56], %65 {strides = array<i32>} : memref<2x64xf32, #tpu.memory_space<vmem>>, vector<2x8xf32>,
    %c0_47 = arith.constant 0 : index
    %c0_48 = arith.constant 0 : index
    %67 = vector.load %arg4[%c0_47, %c0_48] : memref<2x64xf32, #tpu.memory_space<vmem>>, vector<2x64xf32>
    %c48_49 = arith.constant 48 : index
    %c0_50 = arith.constant 0 : index
    %68 = vector.load %arg1[%c48_49, %c0_50] : memref<148x32xf32, #tpu.memory_space<vmem>>, vector<64x32xf32>
    %cst_51 = arith.constant dense<0.000000e+00> : vector<2x32xf32>
    %69 = tpu.matmul %67, %68, %cst_51 {dimension_numbers = #tpu.dot_dimension_numbers<[1], [0], [0], [1], [0, 0, 1, 1], [], []>} : vector<2x64xf32>, vector<64x32xf32>, vector<2x32xf32> -> vector<2x32xf32>
    %c146 = arith.constant 146 : index
    %c0_52 = arith.constant 0 : index
    %70 = vector.load %arg1[%c146, %c0_52] : memref<148x32xf32, #tpu.memory_space<vmem>>, vector<1x32xf32>
    %71 = vector.broadcast %70 : vector<1x32xf32> to vector<2x32xf32>
    %72 = arith.addf %69, %71 : vector<2x32xf32>
    %cst_53 = arith.constant 0.000000e+00 : f32
    %73 = vector.broadcast %cst_53 : f32 to vector<2x32xf32>
    %74 = arith.maximumf %72, %73 : vector<2x32xf32>
    %c112 = arith.constant 112 : index
    %c0_54 = arith.constant 0 : index
    %75 = vector.load %arg1[%c112, %c0_54] : memref<148x32xf32, #tpu.memory_space<vmem>>, vector<32x6xf32>
    %cst_55 = arith.constant dense<0.000000e+00> : vector<2x6xf32>
    %76 = tpu.matmul %74, %75, %cst_55 {dimension_numbers = #tpu.dot_dimension_numbers<[1], [0], [0], [1], [0, 0, 1, 1], [], []>} : vector<2x32xf32>, vector<32x6xf32>, vector<2x6xf32> -> vector<2x6xf32>
    %c147 = arith.constant 147 : index
    %c0_56 = arith.constant 0 : index
    %77 = vector.load %arg1[%c147, %c0_56] : memref<148x32xf32, #tpu.memory_space<vmem>>, vector<1x6xf32>
    %78 = vector.broadcast %77 : vector<1x6xf32> to vector<2x6xf32>
    %79 = arith.addf %76, %78 : vector<2x6xf32>
    %c0_57 = arith.constant 0 : index
    %c0_58 = arith.constant 0 : index
    %80 = vector.load %arg2[%c0_57, %c0_58] : memref<2x6xf32, #tpu.memory_space<vmem>>, vector<2x6xf32>
    tpu.vector_store %arg2[%c0_57, %c0_58], %79 {strides = array<i32>} : memref<2x6xf32, #tpu.memory_space<vmem>>, vector<2x6xf32>,
    return
  }
}

</mosaic_0001>

<bundles_post_ra>
// kernel: cnn_forward.2
= control target key start
LH: loop header
LB: loop body
LE: loop exit
PB: predicated region body
PF: predicated region fallthrough
CT: control target
= control target key end

     0   :  { %vm69_vm0 = vcmask 1043456   ;;  %v1434_v2 = vmov 0.0   ;;  %vm32_vm1 = vcmask 31744   ;;  %vm1435_vm2 = vmmov 0   ;;  %s1696_s0 = inlined_call_operand.vmem [shape: f32[148,32], index: 0, kind: input, shape index: {}]   ;;  %s1697_s1 = inlined_call_operand.vmem [shape: f32[2,4,16], index: 1, kind: input, shape index: {}]   ;;  %s1698_s2 = inlined_call_operand.hbm [shape: f32[2,6], index: 2, kind: output, shape index: {}]  }
   0x1   :  { %v48_v0 = vld [vmem:[%s1696_s0 + $0x8] sm:$0xf]  ;;  %v12_v1 = vld [vmem:[%s1697_s1] sm:$0xff]  ;;  %1267 = vmatprep.subr.mxu0 %v1434_v2  ;;  %1284 = vmatprep.subr.mxu1 %v1434_v2  ;;  %v1182_v5 = vld [vmem:[%s1697_s1 + $0x10] sm:$0xff]  ;;  %vm40_vm3 = vcmask 27648  }
   0x2   :  { %v42_v3 = vld [vmem:[%s1696_s0] sm:$0xf]  ;;  %v1181_v4 = vld [vmem:[%s1697_s1 + $0x8] sm:$0xff]  ;;  %1268 = vmatpush3.msk.msra.mxu0 %vm69_vm0, %v48_v0  ;;  %1269 = vmatprep.mubr.msk.f32.mxu0 %vm1435_vm2, %v1434_v2  ;;  %33 = vst.msk [vmem:[#allocation2] sm:$0xff] %vm32_vm1, %v12_v1  ;;  %v1183_v6 = vld [vmem:[%s1697_s1 + $0x18] sm:$0xff] }
   0x3   :  { %34 = vst.msk [vmem:[#allocation2 + $0x8] sm:$0xff] %vm32_vm1, %v1181_v4 }
   0x4   :  { %7 = vsyncpa [#allocation5], 0  ;;  %1285 = vmatpush3.msk.msra.mxu1 %vm69_vm0, %v42_v3  ;;  %1286 = vmatprep.mubr.msk.f32.mxu1 %vm1435_vm2, %v1434_v2  ;;  %38 = vst.msk [vmem:[#allocation2 + $0x10] sm:$0xff] %vm32_vm1, %v1182_v5  ;;  %v271_v7 = vld [vmem:[%s1696_s0 + $0x10] sm:$0xf]  ;;  %v406_v23 = vld [vmem:[%s1696_s0 + $0x20] sm:$0xff] }
   0x5   :  { %39 = vst.msk [vmem:[#allocation2 + $0x18] sm:$0xff] %vm32_vm1, %v1183_v6  ;;  %1301 = vmatprep.subr.mxu0 %v1434_v2  ;;  %1318 = vmatprep.subr.mxu1 %v406_v23  ;;  %v1546_v24 = vld [vmem:[%s1696_s0 + $0x18] sm:$0xff]  ;;  %v1202_v51 = vld [vmem:[%s1696_s0 + $0x90] ss:$0 sm:$0xff]  ;;  %vm412_vm4 = vcmask 1046528   ;;  %vm422_vm5 = vcmask 64512  }
   0x6   :  { %41 = vst.msk [vmem:[#allocation2 + $0x20] sm:$0xf] %vm40_vm3, %v1434_v2  ;;  %vm610_vm6 = vcmask 1045504   ;;  %vm818_vm7 = vcmask 58368   ;;  %vm933_vm8 = vcmask 1041409   ;;  %s1437_s4 = smov 32  }
   0x7   :  { %s1438_s5 = smov 8   ;;  %s1439_s10 = smov 24   ;;  %vm943_vm9 = vcmask 123968   ;;  %vm951_vm10 = vcmask 189568   ;;  %vm959_vm11 = vcmask 255168   ;;  %vm967_vm12 = vcmask 320768  }
   0x8   :  { %s1441_s15 = smov 16   ;;  %s1442_s16 = smov 48   ;;  %vm975_vm13 = vcmask 386368   ;;  %vm983_vm14 = vcmask 451968   ;;  %vm991_vm15 = vcmask 517568  }
   0x9   :  { %v43_v9 = vld [vmem:[#allocation2] sm:$0xff]  ;;  %s1443_s24 = smov 40   ;;  %s1444_s29 = smov 56  }
   0xa   :  { %v49_v8 = vld [vmem:[#allocation2 + $0x1] sm:$0xff]  ;;  %1287 = vmatmul.mubr.msk.f32.vlgmr.msra.gmra.mrb[0].mxu1 %vm32_vm1, %v43_v9 }
   0xb   :  { %1270 = vmatmul.mubr.msk.f32.vlgmr.msra.gmra.mrb[0].mxu0 %vm32_vm1, %v49_v8  ;;  %v50_v10 = vld [vmem:[#allocation2 + $0x9] sm:$0xff]  ;;  %1289 = vmatprep.mubr.msk.f32.mxu1 %vm1435_vm2, %v1434_v2 }
   0xc   :  { %1302 = vmatpush3.msk.msra.mxu0 %vm69_vm0, %v271_v7  ;;  %1272 = vmatprep.mubr.msk.f32.mxu0 %vm1435_vm2, %v1434_v2  ;;  %v44_v11 = vld [vmem:[#allocation2 + $0x8] sm:$0xff]  ;;  %v51_v12 = vld [vmem:[#allocation2 + $0x11] sm:$0xff]  ;;  %vm1007_vm0 = vcmask 523264  }
   0xd   :  { %v45_v13 = vld [vmem:[#allocation2 + $0x10] sm:$0xff]  ;;  %v52_v14 = vld [vmem:[#allocation2 + $0x19] sm:$0xff]  ;;  %v53_v16 = vld [vmem:[#allocation2 + $0x21] sm:$0x3]  ;;  %1319 = vmatpush3.msra.mxu1 %v406_v23 }
   0xe   :  { %1290 = vmatmul.mubr.msk.f32.gmra.mrb[2].mxu1 %vm32_vm1, %v44_v11  ;;  %v46_v15 = vld [vmem:[#allocation2 + $0x18] sm:$0xff]  ;;  %v47_v17 = vld [vmem:[#allocation2 + $0x20] sm:$0x3]  ;;  %v272_v18 = vld [vmem:[#allocation2 + $0x2] sm:$0xff]  ;;  %1326 = vmatprep.subr.mxu1 %v1546_v24 }
   0xf   :  { %1273 = vmatmul.mubr.msk.f32.gmra.mrb[2].mxu0 %vm32_vm1, %v50_v10  ;;  %1292 = vmatprep.mubr.msk.f32.mxu1 %vm1435_vm2, %v1434_v2  ;;  %v273_v19 = vld [vmem:[#allocation2 + $0xa] sm:$0xff]  ;;  %v274_v20 = vld [vmem:[#allocation2 + $0x12] sm:$0xff]  ;;  %v275_v21 = vld [vmem:[#allocation2 + $0x1a] sm:$0xff] }
  0x10   :  { %1275 = vmatprep.mubr.msk.f32.mxu0 %vm1435_vm2, %v1434_v2  ;;  %v276_v22 = vld [vmem:[#allocation2 + $0x22] sm:$0x3] }
  0x12   :  { %1293 = vmatmul.mubr.msk.f32.gmra.mrb[4].mxu1 %vm32_vm1, %v45_v13 }
  0x13   :  { %1276 = vmatmul.mubr.msk.f32.gmra.mrb[4].mxu0 %vm32_vm1, %v51_v12  ;;  %1295 = vmatprep.mubr.msk.f32.mxu1 %vm1435_vm2, %v1434_v2 }
  0x14   :  { %1278 = vmatprep.mubr.msk.f32.mxu0 %vm1435_vm2, %v1434_v2 }
  0x16   :  { %1296 = vmatmul.mubr.msk.f32.gmra.mrb[6].mxu1 %vm32_vm1, %v46_v15 }
  0x17   :  { %1279 = vmatmul.mubr.msk.f32.gmra.mrb[6].mxu0 %vm32_vm1, %v52_v14  ;;  %1298 = vmatprep.mubr.msk.f32.mxu1 %vm1435_vm2, %v1434_v2 }
  0x18   :  { %1281 = vmatprep.mubr.msk.f32.mxu0 %vm1435_vm2, %v1434_v2 }
  0x1a   :  { %1299 = vmatmul.mubr.msk.f32.gmra.mrb[8].mxu1 %vm32_vm1, %v47_v17 }
  0x1b   :  { %1282 = vmatmul.mubr.msk.f32.gmra.mrb[8].mxu0 %vm32_vm1, %v53_v16 }
  0x1c   :  { %1303 = vmatprep.mubr.msk.f32.mxu0 %vm1435_vm2, %v1434_v2 }
  0x1f   :  { %1304 = vmatmul.mubr.msk.f32.vlgmr.msra.gmra.mrb[10].mxu0 %vm32_vm1, %v272_v18 }
  0x20   :  { %1306 = vmatprep.mubr.msk.f32.mxu0 %vm1435_vm2, %v1434_v2 }
  0x23   :  { %1307 = vmatmul.mubr.msk.f32.gmra.mrb[12].mxu0 %vm32_vm1, %v273_v19 }
  0x24   :  { %1309 = vmatprep.mubr.msk.f32.mxu0 %vm1435_vm2, %v1434_v2 }
  0x27   :  { %1310 = vmatmul.mubr.msk.f32.gmra.mrb[14].mxu0 %vm32_vm1, %v274_v20  ;;  %v609_v20 = vld [vmem:[%s1696_s0 + $0x28] sm:$0xff] }
  0x28   :  { %1312 = vmatprep.mubr.msk.f32.mxu0 %vm1435_vm2, %v1434_v2 }
  0x2b   :  { %1313 = vmatmul.mubr.msk.f32.gmra.mrb[16].mxu0 %vm32_vm1, %v275_v21 }
  0x2c   :  { %1315 = vmatprep.mubr.msk.f32.mxu0 %vm1435_vm2, %v1434_v2 }
  0x2f   :  { %1316 = vmatmul.mubr.msk.f32.gmra.mrb[18].mxu0 %vm32_vm1, %v276_v22  ;;  %vm1091_vm1 = vcmask 261120  }
  0x30   :  { %1358 = vmatprep.mubr.msk.f32.mxu0 %vm1435_vm2, %v1434_v2 }
  0xdd   :  { %v247_v26 = vpop.f32.mrb[0].mxu1 }
  0xde   :  { %v139_v25 = vpop.f32.mrb[0].mxu0  ;;  %v1288_v29 = vpop.f32.mrb[1].mxu1 }
  0xdf   :  { %v248_v27 = vadd.f32 %v247_v26, %v139_v25  ;;  %v1271_v28 = vpop.f32.mrb[1].mxu0 }
  0xe1   :  { %v252_v31 = vpop.f32.mrb[2].mxu1 }
  0xe2   :  { %v144_v30 = vpop.f32.mrb[2].mxu0  ;;  %v1291_v34 = vpop.f32.mrb[3].mxu1 }
  0xe3   :  { %v253_v32 = vadd.f32 %v252_v31, %v144_v30  ;;  %v1274_v33 = vpop.f32.mrb[3].mxu0  ;;  %v738_v34 = vlaneseq }
  0xe5   :  { %v257_v36 = vpop.f32.mrb[4].mxu1 }
  0xe6   :  { %v149_v35 = vpop.f32.mrb[4].mxu0  ;;  %v1294_v39 = vpop.f32.mrb[5].mxu1 }
  0xe7   :  { %v258_v37 = vadd.f32 %v257_v36, %v149_v35  ;;  %v1277_v38 = vpop.f32.mrb[5].mxu0  ;;  %v739_v36 = vshrl.u32 %v738_v34, 7 }
  0xe9   :  { %v262_v41 = vpop.f32.mrb[6].mxu1 }
  0xea   :  { %v154_v40 = vpop.f32.mrb[6].mxu0  ;;  %v1297_v44 = vpop.f32.mrb[7].mxu1 }
  0xeb   :  { %v263_v42 = vadd.f32 %v262_v41, %v154_v40  ;;  %v1280_v43 = vpop.f32.mrb[7].mxu0 }
  0xed   :  { %v267_v46 = vpop.f32.mrb[8].mxu1 }
  0xee   :  { %v159_v45 = vpop.f32.mrb[8].mxu0  ;;  %v1300_v49 = vpop.f32.mrb[9].mxu1 }
  0xef   :  { %v268_v47 = vadd.f32 %v267_v46, %v159_v45  ;;  %v1283_v48 = vpop.f32.mrb[9].mxu0 }
  0xf2   :  { %v361_v50 = vpop.f32.mrb[10].mxu0 }
  0xf3   :  { %v385_v52 = vadd.f32 %v361_v50, %v248_v27  ;;  %v1305_v53 = vpop.f32.mrb[11].mxu0 }
  0xf5   :  { %v395_v54 = vadd.f32 %v1202_v51, %v385_v52 }
  0xf6   :  { %v366_v55 = vpop.f32.mrb[12].mxu0 }
  0xf7   :  { %v386_v56 = vadd.f32 %v366_v55, %v253_v32  ;;  %v1308_v57 = vpop.f32.mrb[13].mxu0  ;;  %v400_v58 = vmax.f32 %v395_v54, 0.0 }
  0xf9   :  { %v396_v59 = vadd.f32 %v1202_v51, %v386_v56  ;;  %v413_v0 = vrot.slane %v400_v58, 1  ;;  %v611_v1 = vrot.slane %v400_v58, 2 }
  0xfa   :  { %v371_v60 = vpop.f32.mrb[14].mxu0 }
  0xfb   :  { %v401_v61 = vmax.f32 %v396_v59, 0.0  ;;  %v387_v62 = vadd.f32 %v371_v60, %v258_v37  ;;  %v1311_v63 = vpop.f32.mrb[15].mxu0  ;;  %v1215_v37 = vld [vmem:[%s1696_s0 + $0x91] ss:$0 sm:$0xff] }
  0xfd   :  { %v414_v3 = vrot.slane %v401_v61, 1  ;;  %v612_v4 = vrot.slane %v401_v61, 2  ;;  %v397_v5 = vadd.f32 %v1202_v51, %v387_v62 }
  0xfe   :  { %v376_v6 = vpop.f32.mrb[16].mxu0 }
  0xff   :  { %v402_v7 = vmax.f32 %v397_v5, 0.0  ;;  %v388_v8 = vadd.f32 %v376_v6, %v263_v42  ;;  %v1314_v9 = vpop.f32.mrb[17].mxu0  ;;  %v415_v10 = vsel %vm412_vm4, %v413_v0, %v414_v3  ;;  %v613_v11 = vsel %vm610_vm6, %v611_v1, %v612_v4 }
 0x100   :  { %1320 = vmatprep.mubr.msk.f32.mxu1 %vm422_vm5, %v415_v10 }
 0x101   :  { %v416_v12 = vrot.slane %v402_v7, 1  ;;  %v614_v13 = vrot.slane %v402_v7, 2  ;;  %v398_v14 = vadd.f32 %v1202_v51, %v388_v8 }
 0x102   :  { %v381_v15 = vpop.f32.mrb[18].mxu0 }
 0x103   :  { %v403_v16 = vmax.f32 %v398_v14, 0.0  ;;  %v389_v17 = vadd.f32 %v381_v15, %v268_v47  ;;  %v1317_v18 = vpop.f32.mrb[19].mxu0  ;;  %v417_v19 = vsel %vm412_vm4, %v414_v3, %v416_v12  ;;  %v615_v21 = vsel %vm610_vm6, %v612_v4, %v614_v13 }
 0x104   :  { %1321 = vmatmul.mubr.msk.f32.vlgmr.msra.gmra.mrb[10].mxu1 %vm422_vm5, %v417_v19 }
 0x105   :  { %v418_v22 = vrot.slane %v403_v16, 1  ;;  %v616_v23 = vrot.slane %v403_v16, 2  ;;  %v399_v25 = vadd.f32 %v1202_v51, %v389_v17  ;;  %1327 = vmatpush3.msra.mxu1 %v1546_v24  ;;  %v1436_v24 = vmov 1983009808  }
 0x106   :  { %1334 = vmatprep.subr.mxu1 %v609_v20  ;;  %v736_v33 = vunpack.c.l.s4 %v1436_v24 }
 0x107   :  { %v404_v26 = vmax.f32 %v399_v25, 0.0  ;;  %v419_v27 = vsel %vm412_vm4, %v416_v12, %v418_v22  ;;  %v617_v28 = vsel %vm610_vm6, %v614_v13, %v616_v23 }
 0x108   :  { %1323 = vmatprep.mubr.msk.f32.mxu1 %vm422_vm5, %v419_v27  ;;  %v737_v35 = vunpack.c.0.s8 %v736_v33 }
 0x109   :  { %v420_v29 = vrot.slane %v404_v26, 1  ;;  %v618_v30 = vrot.slane %v404_v26, 2 }
 0x10a   :  { %v1581_v40 = vsub.s32 %v737_v35, %v739_v36 }
 0x10b   :  { %v421_v31 = vsel %vm412_vm4, %v418_v22, %v420_v29  ;;  %v619_v32 = vsel %vm610_vm6, %v616_v23, %v618_v30 }
 0x10c   :  { %1324 = vmatmul.mubr.msk.f32.gmra.mrb[12].mxu1 %vm422_vm5, %v421_v31 }
 0x10d   :  { %1328 = vmatprep.mubr.msk.f32.mxu1 %vm422_vm5, %v400_v58 }
 0x110   :  { %1329 = vmatmul.mubr.msk.f32.vlgmr.msra.gmra.mrb[10].mxu1 %vm422_vm5, %v401_v61 }
 0x111   :  { %1335 = vmatpush3.msra.mxu1 %v609_v20  ;;  %1331 = vmatprep.mubr.msk.f32.mxu1 %vm422_vm5, %v402_v7 }
 0x114   :  { %1332 = vmatmul.mubr.msk.f32.gmra.mrb[12].mxu1 %vm422_vm5, %v403_v16 }
 0x115   :  { %1336 = vmatprep.mubr.msk.f32.mxu1 %vm422_vm5, %v613_v11 }
 0x118   :  { %1337 = vmatmul.mubr.msk.f32.vlgmr.msra.gmra.mrb[10].mxu1 %vm422_vm5, %v615_v21 }
 0x119   :  { %1339 = vmatprep.mubr.msk.f32.mxu1 %vm422_vm5, %v617_v28 }
 0x11c   :  { %1340 = vmatmul.mubr.msk.f32.gmra.mrb[12].mxu1 %vm422_vm5, %v619_v32 }
 0x11d   :  { %1369 = vmatprep.mubr.msk.f32.mxu1 %vm1435_vm2, %v1434_v2  ;;  %vm1165_vm2 = vcmask 41984  }
 0x1eb   :  { %v1338_v38 = vpop.f32.mrb[10].mxu1 }
 0x1ec   :  { %v723_v39 = vadd.f32 %v1338_v38, %v1215_v37  ;;  %v694_v41 = vpop.f32.mrb[11].mxu1 }
 0x1ed   :  { %v722_v42 = vadd.f32 %v1215_v37, %v694_v41 }
 0x1ee   :  { %v727_v43 = vmax.f32 %v723_v39, 0.0 }
 0x1ef   :  { %v726_v44 = vmax.f32 %v722_v42, 0.0  ;;  %v1341_v45 = vpop.f32.mrb[12].mxu1 }
 0x1f0   :  { %v751_v2 = vcombine.high %v727_v43, %v727_v43  ;;  %v758_v46 = vrot.slane %v727_v43, %v1581_v40  ;;  %v725_v47 = vadd.f32 %v1341_v45, %v1215_v37  ;;  %v704_v48 = vpop.f32.mrb[13].mxu1 }
 0x1f1   :  { %v734_v49 = vcombine.high %v726_v44, %v726_v44  ;;  %v741_v50 = vrot.slane %v726_v44, %v1581_v40  ;;  %v724_v51 = vadd.f32 %v1215_v37, %v704_v48 }
 0x1f2   :  { %v765_v52 = vrot.slane %v751_v2, %v1581_v40  ;;  %v766_v53 = vcombine.high %v758_v46, %v758_v46  ;;  %v847_v54 = vsel %vm818_vm7, %v758_v46, -inf  ;;  %v729_v55 = vmax.f32 %v725_v47, 0.0 }
 0x1f3   :  { %v848_v56 = vrot.slane %v847_v54, 4  ;;  %v748_v57 = vrot.slane %v734_v49, %v1581_v40  ;;  %v749_v58 = vcombine.high %v741_v50, %v741_v50  ;;  %v819_v59 = vsel %vm818_vm7, %v741_v50, -inf }
 0x1f4   :  { %v767_v60 = vcombine.high %v765_v52, %v765_v52  ;;  %v854_v61 = vsel %vm818_vm7, %v766_v53, -inf  ;;  %v861_v62 = vsel %vm818_vm7, %v765_v52, -inf  ;;  %v820_v63 = vrot.slane %v819_v59, 4 }
 0x1f5   :  { %v849_v0 = vmax.f32 %v847_v54, %v848_v56  ;;  %v855_v1 = vrot.slane %v854_v61, 4  ;;  %v862_v3 = vrot.slane %v861_v62, 4  ;;  %v750_v4 = vcombine.high %v748_v57, %v748_v57 }
 0x1f6   :  { %v868_v5 = vsel %vm818_vm7, %v767_v60, -inf  ;;  %v821_v6 = vmax.f32 %v819_v59, %v820_v63  ;;  %v826_v7 = vsel %vm818_vm7, %v749_v58, -inf  ;;  %v833_v8 = vsel %vm818_vm7, %v748_v57, -inf }
 0x1f7   :  { %v850_v9 = vrot.slane %v849_v0, 2  ;;  %v1594_v10 = vmax.f32 %v854_v61, %v855_v1  ;;  %v1596_v11 = vmax.f32 %v861_v62, %v862_v3  ;;  %v869_v12 = vrot.slane %v868_v5, 4 }
 0x1f8   :  { %v822_v13 = vrot.slane %v821_v6, 2  ;;  %v827_v14 = vrot.slane %v826_v7, 4  ;;  %v834_v15 = vrot.slane %v833_v8, 4  ;;  %v840_v16 = vsel %vm818_vm7, %v750_v4, -inf }
 0x1f9   :  { %v857_v17 = vrot.slane %v1594_v10, 2  ;;  %v864_v18 = vrot.slane %v1596_v11, 2  ;;  %v1601_v19 = vmax.f32 %v868_v5, %v869_v12  ;;  %v841_v20 = vrot.slane %v840_v16, 4 }
 0x1fa   :  { %v1603_v21 = vmax.f32 %v821_v6, %v822_v13  ;;  %v828_v22 = vmax.f32 %v826_v7, %v827_v14  ;;  %v835_v23 = vmax.f32 %v833_v8, %v834_v15  ;;  %v785_v25 = vcombine.high %v729_v55, %v729_v55 }
 0x1fb   :  { %v842_v26 = vmax.f32 %v840_v16, %v841_v20  ;;  %v792_v27 = vrot.slane %v729_v55, %v1581_v40  ;;  %v728_v28 = vmax.f32 %v724_v51, 0.0  ;;  %v851_v29 = vmax.f32 %v849_v0, %v850_v9 }
 0x1fc   :  { %v824_v30 = vrot.slane %v1603_v21, 1  ;;  %v836_v31 = vrot.slane %v835_v23, 2  ;;  %v799_v32 = vrot.slane %v785_v25, %v1581_v40  ;;  %v829_v24 = vrot.slane %v828_v22, 2 }
 0x1fd   :  { %v800_v33 = vcombine.high %v792_v27, %v792_v27  ;;  %v903_v34 = vsel %vm818_vm7, %v792_v27, -inf  ;;  %v768_v35 = vcombine.high %v728_v28, %v728_v28  ;;  %v775_v36 = vrot.slane %v728_v28, %v1581_v40 }
 0x1fe   :  { %v801_v37 = vcombine.high %v799_v32, %v799_v32  ;;  %v904_v38 = vrot.slane %v903_v34, 4  ;;  %v917_v39 = vsel %vm818_vm7, %v799_v32, -inf  ;;  %v852_v41 = vrot.slane %v851_v29, 1 }
 0x1ff   :  { %v910_v42 = vsel %vm818_vm7, %v800_v33, -inf  ;;  %v918_v43 = vrot.slane %v917_v39, 4  ;;  %v782_v44 = vrot.slane %v768_v35, %v1581_v40  ;;  %v783_v45 = vcombine.high %v775_v36, %v775_v36 }
 0x200   :  { %v905_v2 = vmax.f32 %v903_v34, %v904_v38  ;;  %v911_v46 = vrot.slane %v910_v42, 4  ;;  %v924_v47 = vsel %vm818_vm7, %v801_v37, -inf  ;;  %v875_v48 = vsel %vm818_vm7, %v775_v36, -inf }
 0x201   :  { %v919_v49 = vmax.f32 %v917_v39, %v918_v43  ;;  %v925_v50 = vrot.slane %v924_v47, 4  ;;  %v784_v51 = vcombine.high %v782_v44, %v782_v44  ;;  %v876_v52 = vrot.slane %v875_v48, 4 }
 0x202   :  { %v906_v53 = vrot.slane %v905_v2, 2  ;;  %v912_v54 = vmax.f32 %v910_v42, %v911_v46  ;;  %v882_v55 = vsel %vm818_vm7, %v783_v45, -inf  ;;  %v889_v56 = vsel %vm818_vm7, %v782_v44, -inf }
 0x203   :  { %v920_v57 = vrot.slane %v919_v49, 2  ;;  %v1617_v40 = vmax.f32 %v924_v47, %v925_v50  ;;  %v877_v58 = vmax.f32 %v875_v48, %v876_v52  ;;  %v883_v59 = vrot.slane %v882_v55, 4  ;;  %v994_v52 = vld [vmem:[%s1696_s0 + $0x30] sm:$0xff] }
 0x204   :  { %v913_v60 = vrot.slane %v912_v54, 2  ;;  %v890_v61 = vrot.slane %v889_v56, 4  ;;  %v896_v62 = vsel %vm818_vm7, %v784_v51, -inf  ;;  %v853_v63 = vmax.f32 %v851_v29, %v852_v41 }
 0x205   :  { %v878_v0 = vrot.slane %v877_v58, 2  ;;  %v884_v1 = vmax.f32 %v882_v55, %v883_v59  ;;  %v897_v3 = vrot.slane %v896_v62, 4  ;;  %v907_v4 = vmax.f32 %v905_v2, %v906_v53  ;;  %v995_v53 = vld [vmem:[%s1696_s0 + $0x38] sm:$0xff] }
 0x206   :  { %v891_v5 = vmax.f32 %v889_v56, %v890_v61  ;;  %v830_v6 = vmax.f32 %v828_v22, %v829_v24  ;;  %v843_v7 = vrot.slane %v842_v26, 2  ;;  %v837_v8 = vmax.f32 %v835_v23, %v836_v31  ;;  %v997_v61 = vld [vmem:[%s1696_s0 + $0x48] sm:$0xff] }
 0x207   :  { %v879_v9 = vmax.f32 %v877_v58, %v878_v0  ;;  %v898_v12 = vmax.f32 %v896_v62, %v897_v3  ;;  %v908_v13 = vrot.slane %v907_v4, 1  ;;  %v885_v14 = vrot.slane %v884_v1, 2 }
 0x208   :  { %v892_v15 = vrot.slane %v891_v5, 2  ;;  %v831_v16 = vrot.slane %v830_v6, 1  ;;  %v844_v20 = vmax.f32 %v842_v26, %v843_v7  ;;  %v838_v25 = vrot.slane %v837_v8, 1  ;;  %v1082_v7 = vld [vmem:[%s1696_s0 + $0x70] sm:$0xff] }
 0x209   :  { %v880_v27 = vrot.slane %v879_v9, 1  ;;  %v909_v28 = vmax.f32 %v907_v4, %v908_v13  ;;  %v886_v32 = vmax.f32 %v884_v1, %v885_v14  ;;  %v899_v29 = vrot.slane %v898_v12, 2  ;;  %v998_v4 = vld [vmem:[%s1696_s0 + $0x50] sm:$0xff]  ;;  %v1000_v14 = vld [vmem:[%s1696_s0 + $0x60] sm:$0xff] }
 0x20a   :  { %v832_v33 = vmax.f32 %v830_v6, %v831_v16  ;;  %v845_v34 = vrot.slane %v844_v20, 1  ;;  %v839_v35 = vmax.f32 %v837_v8, %v838_v25  ;;  %v893_v36 = vmax.f32 %v891_v5, %v892_v15  ;;  %v1083_v8 = vld [vmem:[%s1696_s0 + $0x78] sm:$0xff]  ;;  %v1001_v15 = vld [vmem:[%s1696_s0 + $0x68] sm:$0xff] }
 0x20b   :  { %v963_v22 = vsel %vm933_vm8, %v909_v28, %v853_v63  ;;  %v887_v24 = vrot.slane %v886_v32, 1  ;;  %v900_v23 = vmax.f32 %v898_v12, %v899_v29  ;;  %v865_v31 = vmax.f32 %v1596_v11, %v864_v18 }
 0x20c   :  { %964 = vrot.lane.b32.xlu1 %v963_v22, %s1437_s4  ;;  %v846_v26 = vmax.f32 %v844_v20, %v845_v34  ;;  %v894_v37 = vrot.slane %v893_v36, 1  ;;  %v921_v38 = vmax.f32 %v919_v49, %v920_v57  ;;  %v858_v39 = vmax.f32 %v1594_v10, %v857_v17 }
 0x20d   :  { %v888_v41 = vmax.f32 %v886_v32, %v887_v24  ;;  %v901_v42 = vrot.slane %v900_v23, 1  ;;  %v866_v43 = vrot.slane %v865_v31, 1  ;;  %v914_v44 = vmax.f32 %v912_v54, %v913_v60  ;;  %v996_v60 = vld [vmem:[%s1696_s0 + $0x40] sm:$0xff]  ;;  %v1216_v24 = vld [vmem:[%s1696_s0 + $0x92] ss:$0 sm:$0xff] }
 0x20e   :  { %v895_v45 = vmax.f32 %v893_v36, %v894_v37  ;;  %v922_v2 = vrot.slane %v921_v38, 1  ;;  %v859_v46 = vrot.slane %v858_v39, 1  ;;  %v871_v47 = vrot.slane %v1601_v19, 2  ;;  %v1085_v36 = vld [vmem:[%s1696_s0 + $0x88] sm:$0xff] }
 0x20f   :  { %v939_v11 = vsel %vm933_vm8, %v888_v41, %v832_v33  ;;  %v902_v18 = vmax.f32 %v900_v23, %v901_v42  ;;  %v867_v48 = vmax.f32 %v865_v31, %v866_v43  ;;  %v915_v50 = vrot.slane %v914_v44, 1 }
 0x210   :  { %940 = vrot.lane.b32.xlu0 %v939_v11, %s1438_s5  ;;  %v947_v49 = vsel %vm933_vm8, %v895_v45, %v839_v35  ;;  %v923_v51 = vmax.f32 %v921_v38, %v922_v2  ;;  %v860_v10 = vmax.f32 %v858_v39, %v859_v46  ;;  %v872_v17 = vmax.f32 %v1601_v19, %v871_v47  ;;  %v1084_v35 = vld [vmem:[%s1696_s0 + $0x80] sm:$0xff]  ;;  %v1218_v38 = vld [vmem:[%s1696_s0 + $0x93] ss:$0 sm:$0xff] }
 0x211   :  { %v955_v54 = vsel %vm933_vm8, %v902_v18, %v846_v26  ;;  %v916_v55 = vmax.f32 %v914_v44, %v915_v50  ;;  %v927_v56 = vrot.slane %v1617_v40, 2  ;;  %v1440_v58 = vmov 0.0|0.0  }
 0x212   :  { %956 = vrot.lane.b32.xlu1 %v955_v54, %s1439_s10  ;;  %v979_v57 = vsel %vm933_vm8, %v923_v51, %v867_v48  ;;  %1372 = vmatprep.subr.bf16.mxu0 %v1440_v58  ;;  %v825_v19 = vmax.f32 %v1603_v21, %v824_v30  ;;  %v881_v59 = vmax.f32 %v879_v9, %v880_v27  ;;  %v873_v63 = vrot.slane %v872_v17, 1  ;;  %s1445_s10 = smov [#allocation4]  }
 0x213   :  { %v971_v62 = vsel %vm933_vm8, %v916_v55, %v860_v10  ;;  %v928_v0 = vmax.f32 %v1617_v40, %v927_v56  ;;  %v1373_v1 = vpack.c.bf16 %v995_v53, %v994_v52  ;;  %1384 = vmatprep.subr.bf16.mxu1 %v1440_v58  ;;  %v1376_v3 = vpack.c.bf16 %v997_v61, %v996_v60  ;;  %v999_v40 = vld [vmem:[%s1696_s0 + $0x58] sm:$0xff]  ;;  %s1173_s11 = sshll.u32 %s1445_s10, 4  ;;  %s1174_s11 = int_to_ptr.vmem [resolvable:$true] %s1173_s11 }
 0x214   :  { %948 = vrot.lane.b32.xlu0 %v947_v49, %s1441_s15  ;;  %v934_v21 = vsel %vm933_vm8, %v881_v59, %v825_v19  ;;  %v874_v5 = vmax.f32 %v872_v17, %v873_v63  ;;  %v1385_v9 = vpack.c.bf16 %v1083_v8, %v1082_v7  ;;  %v1379_v13 = vpack.c.bf16 %v999_v40, %v998_v4  ;;  %s1410_s12 = scalar_lea.vmem %s1174_s11, 32  ;;  %p1415_p1 = scmp.lt.s32.totalorder %s1174_s11, %s1174_s11 }
 0x215   :  { %v929_v30 = vrot.slane %v928_v0, 1  ;;  %936 = vst.msk [vmem:[#allocation3] sm:$0x3] %vm818_vm7, %v934_v21  ;;  %1374 = vmatpush3.bf16.msra.mxu0 %v1373_v1  ;;  %v1382_v16 = vpack.c.bf16 %v1001_v15, %v1000_v14  ;;  %v1388_v22 = vpack.c.bf16 %v1085_v36, %v1084_v35  ;;  %p1411_p0 = scmp.ne.s32.totalorder %s1174_s11, %s1410_s12  ;;  %p1416_p2 = scmp.lt.s32.totalorder %s1410_s12, %s1410_s12 }
 0x216   :  { %980 = vrot.lane.b32.xlu1 %v979_v57, %s1442_s16  ;;  %1375 = vmatprep.subr.bf16.mxu0 %v1440_v58 }
 0x217   :  { %v930_v6 = vmax.f32 %v928_v0, %v929_v30  ;;  %1386 = vmatpush3.bf16.msra.mxu1 %v1385_v9  ;;  %p1417_p3 = por %p1416_p2, %p1415_p1 }
 0x218   :  { %972 = vrot.lane.b32.xlu0 %v971_v62, %s1443_s24  ;;  %1387 = vmatprep.subr.bf16.mxu1 %v1440_v58 }
 0x219   :  { %v987_v12 = vsel %vm933_vm8, %v930_v6, %v874_v5  ;;  %1377 = vmatpush3.bf16.msra.mxu0 %v1376_v3  ;;  %p1418_p4 = pnand %p1417_p3, %p1411_p0 }
 0x21a   :  { %1378 = vmatprep.subr.bf16.mxu0 %v1440_v58 }
 0x21b   :  { %1389 = vmatpush3.bf16.msra.mxu1 %v1388_v22 }
 0x21c   :  { %988 = vrot.lane.b32.xlu0 %v987_v12, %s1444_s29 }
 0x21d   :  { %1380 = vmatpush3.bf16.msra.mxu0 %v1379_v13 }
 0x21e   :  { %1381 = vmatprep.subr.bf16.mxu0 %v1440_v58 }
 0x221   :  { %1383 = vmatpush3.bf16.msra.mxu0 %v1382_v16 }
 0x27e   :  { %v965_v20 = vpop.permute.xlu1 %964 }
 0x282   :  { %v941_v25 = vpop.permute.xlu0 %940 }
 0x283   :  { %944 = vst.msk [vmem:[#allocation3] sm:$0x3] %vm943_vm9, %v941_v25 }
 0x284   :  { %v957_v27 = vpop.permute.xlu1 %956 }
 0x286   :  { %v949_v28 = vpop.permute.xlu0 %948 }
 0x287   :  { %952 = vst.msk [vmem:[#allocation3] sm:$0x3] %vm951_vm10, %v949_v28 }
 0x288   :  { %960 = vst.msk [vmem:[#allocation3] sm:$0x3] %vm959_vm11, %v957_v27  ;;  %v981_v29 = vpop.permute.xlu1 %980 }
 0x289   :  { %968 = vst.msk [vmem:[#allocation3] sm:$0x3] %vm967_vm12, %v965_v20 }
 0x28a   :  { %v973_v32 = vpop.permute.xlu0 %972 }
 0x28b   :  { %976 = vst.msk [vmem:[#allocation3] sm:$0x3] %vm975_vm13, %v973_v32 }
 0x28c   :  { %984 = vst.msk [vmem:[#allocation3] sm:$0x3] %vm983_vm14, %v981_v29 }
 0x28e   :  { %v989_v33 = vpop.permute.xlu0 %988 }
 0x28f   :  { %992 = vst.msk [vmem:[#allocation3] sm:$0x3] %vm991_vm15, %v989_v33 }
 0x296   :  { %v993_v34 = vld [vmem:[#allocation3] sm:$0x3] }
 0x297   :  { %1359 = vmatmul.mubr.msk.f32.vlgmr.msra.gmra.mrb[20].mxu0 %vm1007_vm0, %v993_v34 }
 0x36a   :  { %v1077_v23 = vpop.f32.mrb[20].mxu0 }
 0x36b   :  { %v1078_v31 = vadd.f32 %v1216_v24, %v1077_v23  ;;  %v1360_v26 = vpop.f32.mrb[21].mxu0 }
 0x36d   :  { %v1081_v37 = vmax.f32 %v1078_v31, 0.0 }
 0x36f   :  { %1370 = vmatmul.mubr.msk.f32.vlgmr.msra.gmra.mrb[14].mxu1 %vm1091_vm1, %v1081_v37 }
 0x442   :  { %v1161_v39 = vpop.f32.mrb[14].mxu1 }
 0x443   :  { %v1162_v41 = vadd.f32 %v1218_v38, %v1161_v39  ;;  %v1371_v42 = vpop.f32.mrb[15].mxu1 }
 0x445   :  { %1166 = vst.msk [vmem:[#allocation4] sm:$0x3] %vm1165_vm2, %v1162_v41 }
 0x446   :  { %1421 = shalt.err (!%p1418_p4)
}
 0x447   :  { %s1422_s15 = scalar_lea.hbm %s1698_s2, 32 }
 0x448   :  { %p1423_p5 = scmp.ne.s32.totalorder %s1698_s2, %s1422_s15  ;;  %p1426_p6 = scmp.lt.u32.totalorder %s1422_s15, %s1698_s2 }
 0x44a   :  { %p1428_p7 = pnand %p1426_p6, %p1423_p5 }
 0x44c   :  { %1431 = shalt.err (!%p1428_p7)
}
 0x44d   :  { %1176 = dma.vmem_to_hbm [thread:$0]  %s1174_s11, 32, %s1698_s2, [#allocation5]  }
 0x44e   :  { %1432 = dma.done.wait [#allocation5], 32  }
 0x44f   :  { %1433 = vsyncadd [#allocation5], 4294967264 }
 0x450   :  { %1180 = vsyncpa [#allocation5], 1 }

</bundles_post_ra>
